<compile_context>
chip_gen: v7x
topology: tpu7x:2x2x1
jax: 0.10.0
libtpu: 0.0.40
codegen_flags: <defaults>
</compile_context>

<pallas_src>
import math

import jax
import jax.numpy as jnp
from jax.experimental import pallas as pl
from jax.experimental.pallas import tpu as pltpu


LN_EPS = 1e-6


def _layer_norm(x, gamma, beta, eps=LN_EPS):
    # PyTorch nn.LayerNorm: biased variance over the last dim (f32 stats).
    mu = jnp.mean(x, axis=-1, keepdims=True)
    var = jnp.mean(jnp.square(x - mu), axis=-1, keepdims=True)
    return (x - mu) * jax.lax.rsqrt(var + eps) * gamma + beta


def _gelu_exact(x):
    # nn.GELU() default = exact erf-based GELU.
    return 0.5 * x * (1.0 + jax.lax.erf(x * (1.0 / math.sqrt(2.0))))


def make_encoder_kernel(heads):
    def kernel(x_ref, ln1_g, ln1_b, w_qkv, b_qkv, wo, bo,
               ln2_g, ln2_b, w1, b1, w2, b2, o_ref):
        x = x_ref[0]                       # (S, E) f32
        S, E = x.shape
        hd = E // heads
        scale = 1.0 / math.sqrt(hd)

        # ---- LayerNorm 1 (f32) ----
        xn = _layer_norm(x, ln1_g[...], ln1_b[...])
        xn_bf = xn.astype(jnp.bfloat16)

        # ---- fused QKV projection: one big-N bf16 matmul, f32 accumulation ----
        qkv = jnp.dot(xn_bf, w_qkv[...], preferred_element_type=jnp.float32)
        qkv = qkv + b_qkv[...]             # (S, 3E) f32; columns = [q | k | v]

        # ---- multi-head self-attention, accumulated into the output proj ----
        acc = jnp.zeros((S, E), jnp.float32)
        for h in range(heads):             # small static loop; no concat
            sl = slice(h * hd, (h + 1) * hd)
            qh = (qkv[:, sl] * scale).astype(jnp.bfloat16)          # (S, hd)
            kh_t = qkv[:, E + h * hd:E + (h + 1) * hd].T.astype(jnp.bfloat16)
            vh = qkv[:, 2 * E + h * hd:2 * E + (h + 1) * hd].astype(jnp.bfloat16)

            s = jnp.dot(qh, kh_t, preferred_element_type=jnp.float32)  # (S, S)
            s = s - jnp.max(s, axis=-1, keepdims=True)
            p = jnp.exp(s)
            p = p * pl.reciprocal(jnp.sum(p, axis=-1, keepdims=True), approx=True)

            oh = jnp.dot(p.astype(jnp.bfloat16), vh,
                         preferred_element_type=jnp.float32)           # (S, hd)
            # accumulate this head's slice of the output projection
            acc = acc + jnp.dot(oh.astype(jnp.bfloat16), wo[sl, :],
                                preferred_element_type=jnp.float32)
        attn = acc + bo[...]

        x1 = x + attn                      # first residual (f32)

        # ---- LayerNorm 2 + MLP (bf16 matmuls, f32 residual) ----
        xn2 = _layer_norm(x1, ln2_g[...], ln2_b[...]).astype(jnp.bfloat16)
        hmid = jnp.dot(xn2, w1[...], preferred_element_type=jnp.float32) + b1[...]
        hmid = _gelu_exact(hmid).astype(jnp.bfloat16)
        mlp = jnp.dot(hmid, w2[...], preferred_element_type=jnp.float32) + b2[...]

        o_ref[0] = (x1 + mlp).astype(o_ref.dtype)

    return kernel


_PARAM_ORDER = ["ln1_g", "ln1_b", "w_qkv", "b_qkv", "wo", "bo",
                "ln2_g", "ln2_b", "w1", "b1", "w2", "b2"]


def _vmem_limit_bytes(S, E, heads, mlp):
    f32, bf16 = 4, 2
    weights = 2 * (3 * E * E + E * E + E * mlp + mlp * E) * bf16  # double-buffer worst case
    small = 2 * (3 * E + 6 * E + mlp) * f32                        # biases + LN params
    io = 2 * 2 * S * E * f32                                       # x / out double buffers
    acts = (3 * S * E + S * S + 4 * S * E + 2 * S * mlp) * f32     # qkv, scores, residuals, hmid
    total = weights + small + io + 2 * acts + (4 << 20)            # + headroom
    return max(min(total, 64 << 20), 16 << 20)                     # cap at v7x's 64 MiB VMEM


def transformer_encoder_layer(x, params, heads):
    B, S, E = x.shape
    mlp = params["w1"].shape[1]

    def full_spec(shape):
        n = len(shape)
        # Grid-invariant index_map -> Pallas fetches the block once, no per-step re-DMA.
        return pl.BlockSpec(shape, lambda b, n=n: (0,) * n)

    in_specs = [pl.BlockSpec((1, S, E), lambda b: (b, 0, 0))]
    args = [x]
    for name in _PARAM_ORDER:
        p = params[name]
        in_specs.append(full_spec(p.shape))
        args.append(p)

    return pl.pallas_call(
        make_encoder_kernel(heads),
        out_shape=jax.ShapeDtypeStruct((B, S, E), x.dtype),
        grid=(B,),
        in_specs=in_specs,
        out_specs=pl.BlockSpec((1, S, E), lambda b: (b, 0, 0)),
        compiler_params=pltpu.CompilerParams(
            dimension_semantics=("parallel",),                  # batch is independent
            vmem_limit_bytes=_vmem_limit_bytes(S, E, heads, mlp)),
    )(*args)


def init_params(key, E, heads, mlp_size):
    """Deterministic params laid out like PyTorch's module, then pre-transposed,
    QKV-fused, and matmul weights stored in bf16 (biases / LN params stay f32)."""
    ks = jax.random.split(key, 10)
    s = 0.02
    in_proj_w = jax.random.normal(ks[0], (3 * E, E), jnp.float32) * s
    in_proj_b = jax.random.normal(ks[1], (3 * E,), jnp.float32) * s
    out_w = jax.random.normal(ks[2], (E, E), jnp.float32) * s
    out_b = jax.random.normal(ks[3], (E,), jnp.float32) * s
    fc1_w = jax.random.normal(ks[4], (mlp_size, E), jnp.float32) * s
    fc1_b = jax.random.normal(ks[5], (mlp_size,), jnp.float32) * s
    fc2_w = jax.random.normal(ks[6], (E, mlp_size), jnp.float32) * s
    fc2_b = jax.random.normal(ks[7], (E,), jnp.float32) * s
    ln1_g = 1.0 + 0.1 * jax.random.normal(ks[8], (E,), jnp.float32)
    ln1_b = 0.1 * jax.random.normal(ks[9], (E,), jnp.float32)
    ln2_g = jnp.ones((E,), jnp.float32)
    ln2_b = jnp.zeros((E,), jnp.float32)

    r2 = lambda v: v.reshape(1, -1)     # keep 1-D params as (1, D) 2-D tiles
    bf = lambda w: w.astype(jnp.bfloat16)
    return {
        "ln1_g": r2(ln1_g), "ln1_b": r2(ln1_b),
        # fused (E, 3E) QKV weight: columns [0:E)=q, [E:2E)=k, [2E:3E)=v
        "w_qkv": bf(in_proj_w.T), "b_qkv": r2(in_proj_b),
        "wo": bf(out_w.T),        "bo": r2(out_b),
        "ln2_g": r2(ln2_g), "ln2_b": r2(ln2_b),
        "w1": bf(fc1_w.T), "b1": r2(fc1_b),
        "w2": bf(fc2_w.T), "b2": r2(fc2_b),
    }


def reference(x, p, heads):
    """Pure-JAX f32 reference mirroring PyTorch semantics (bf16 weights upcast)."""
    B, S, E = x.shape
    hd = E // heads

    def ln(v, g, b):
        mu = jnp.mean(v, -1, keepdims=True)
        var = jnp.mean((v - mu) ** 2, -1, keepdims=True)
        return (v - mu) / jnp.sqrt(var + LN_EPS) * g + b

    w_qkv = p["w_qkv"].astype(jnp.float32)
    wo = p["wo"].astype(jnp.float32)
    w1 = p["w1"].astype(jnp.float32)
    w2 = p["w2"].astype(jnp.float32)

    xn = ln(x, p["ln1_g"], p["ln1_b"])
    qkv = xn @ w_qkv + p["b_qkv"]
    q, k, v = qkv[..., :E], qkv[..., E:2 * E], qkv[..., 2 * E:]
    qh = q.reshape(B, S, heads, hd).transpose(0, 2, 1, 3)
    kh = k.reshape(B, S, heads, hd).transpose(0, 2, 1, 3)
    vh = v.reshape(B, S, heads, hd).transpose(0, 2, 1, 3)
    s = jnp.einsum("bhqd,bhkd->bhqk", qh / math.sqrt(hd), kh)
    patt = jax.nn.softmax(s, axis=-1)
    o = jnp.einsum("bhqk,bhkd->bhqd", patt, vh).transpose(0, 2, 1, 3)
    o = o.reshape(B, S, E) @ wo + p["bo"]
    x1 = x + o
    xn2 = ln(x1, p["ln2_g"], p["ln2_b"])
    h = xn2 @ w1 + p["b1"]
    h = 0.5 * h * (1.0 + jax.lax.erf(h / math.sqrt(2.0)))
    return x1 + (h @ w2 + p["b2"])


if __name__ == "__main__":
    B, S, E, heads, mlp_size = 2, 8, 32, 4, 64

    key = jax.random.PRNGKey(0)
    kx, kp = jax.random.split(key)
    x = jax.random.normal(kx, (B, S, E), jnp.float32)
    params = init_params(kp, E, heads, mlp_size)

    out = transformer_encoder_layer(x, params, heads)
    out = jax.block_until_ready(out)

    ref = reference(x, params, heads)
    assert out.shape == (B, S, E)
    # bf16 matmul operands + approx reciprocal => small drift vs the f32 reference.
    assert jnp.allclose(out, ref, rtol=2e-2, atol=2e-2), \
        float(jnp.max(jnp.abs(out - ref)))

    print("KERNEL_OK")
</pallas_src>

<mosaic_0001>
module attributes {stable_mosaic.version = 11 : i64} {
  func.func @kernel(%arg0: i32, %arg1: memref<1x8x32xf32, #tpu.memory_space<vmem>>, %arg2: memref<1x32xf32, #tpu.memory_space<vmem>>, %arg3: memref<1x32xf32, #tpu.memory_space<vmem>>, %arg4: memref<32x96xbf16, #tpu.memory_space<vmem>>, %arg5: memref<1x96xf32, #tpu.memory_space<vmem>>, %arg6: memref<32x32xbf16, #tpu.memory_space<vmem>>, %arg7: memref<1x32xf32, #tpu.memory_space<vmem>>, %arg8: memref<1x32xf32, #tpu.memory_space<vmem>>, %arg9: memref<1x32xf32, #tpu.memory_space<vmem>>, %arg10: memref<32x64xbf16, #tpu.memory_space<vmem>>, %arg11: memref<1x64xf32, #tpu.memory_space<vmem>>, %arg12: memref<64x32xbf16, #tpu.memory_space<vmem>>, %arg13: memref<1x32xf32, #tpu.memory_space<vmem>>, %arg14: memref<1x8x32xf32, #tpu.memory_space<vmem>>) attributes {dimension_semantics = [#tpu.dimension_semantics<parallel>], iteration_bounds = array<i64: 2>, scalar_prefetch = 0 : i64, scratch_operands = 0 : i64, tpu.core_type = #tpu.core_type<tc>, window_params = [{transform_indices = @transform_0, window_bounds = array<i64: 1, 8, 32>}, {pipeline_mode = #tpu.pipeline_mode<synchronous>, transform_indices = @transform_1, window_bounds = array<i64: 1, 32>}, {pipeline_mode = #tpu.pipeline_mode<synchronous>, transform_indices = @transform_2, window_bounds = array<i64: 1, 32>}, {pipeline_mode = #tpu.pipeline_mode<synchronous>, transform_indices = @transform_3, window_bounds = array<i64: 32, 96>}, {pipeline_mode = #tpu.pipeline_mode<synchronous>, transform_indices = @transform_4, window_bounds = array<i64: 1, 96>}, {pipeline_mode = #tpu.pipeline_mode<synchronous>, transform_indices = @transform_5, window_bounds = array<i64: 32, 32>}, {pipeline_mode = #tpu.pipeline_mode<synchronous>, transform_indices = @transform_6, window_bounds = array<i64: 1, 32>}, {pipeline_mode = #tpu.pipeline_mode<synchronous>, transform_indices = @transform_7, window_bounds = array<i64: 1, 32>}, {pipeline_mode = #tpu.pipeline_mode<synchronous>, transform_indices = @transform_8, window_bounds = array<i64: 1, 32>}, {pipeline_mode = #tpu.pipeline_mode<synchronous>, transform_indices = @transform_9, window_bounds = array<i64: 32, 64>}, {pipeline_mode = #tpu.pipeline_mode<synchronous>, transform_indices = @transform_10, window_bounds = array<i64: 1, 64>}, {pipeline_mode = #tpu.pipeline_mode<synchronous>, transform_indices = @transform_11, window_bounds = array<i64: 64, 32>}, {pipeline_mode = #tpu.pipeline_mode<synchronous>, transform_indices = @transform_12, window_bounds = array<i64: 1, 32>}, {transform_indices = @transform_13, window_bounds = array<i64: 1, 8, 32>}]} {
    %c0 = arith.constant 0 : index
    %c0_0 = arith.constant 0 : index
    %c0_1 = arith.constant 0 : index
    %0 = vector.load %arg1[%c0, %c0_0, %c0_1] : memref<1x8x32xf32, #tpu.memory_space<vmem>>, vector<1x8x32xf32>
    %1 = vector.shape_cast %0 : vector<1x8x32xf32> to vector<8x32xf32>
    %c0_2 = arith.constant 0 : index
    %c0_3 = arith.constant 0 : index
    %2 = vector.load %arg2[%c0_2, %c0_3] : memref<1x32xf32, #tpu.memory_space<vmem>>, vector<1x32xf32>
    %c0_4 = arith.constant 0 : index
    %c0_5 = arith.constant 0 : index
    %3 = vector.load %arg3[%c0_4, %c0_5] : memref<1x32xf32, #tpu.memory_space<vmem>>, vector<1x32xf32>
    %cst = arith.constant dense<0.000000e+00> : vector<8xf32>
    %4 = vector.multi_reduction <add>, %1, %cst [1] : vector<8x32xf32> to vector<8xf32>
    %5 = vector.shape_cast %4 : vector<8xf32> to vector<8x1xf32>
    %cst_6 = arith.constant 3.200000e+01 : f32
    %6 = vector.broadcast %cst_6 : f32 to vector<8x1xf32>
    %7 = arith.divf %5, %6 : vector<8x1xf32>
    %8 = vector.broadcast %7 : vector<8x1xf32> to vector<8x32xf32>
    %9 = arith.subf %1, %8 : vector<8x32xf32>
    %10 = arith.mulf %9, %9 : vector<8x32xf32>
    %cst_7 = arith.constant dense<0.000000e+00> : vector<8xf32>
    %11 = vector.multi_reduction <add>, %10, %cst_7 [1] : vector<8x32xf32> to vector<8xf32>
    %12 = vector.shape_cast %11 : vector<8xf32> to vector<8x1xf32>
    %cst_8 = arith.constant 3.200000e+01 : f32
    %13 = vector.broadcast %cst_8 : f32 to vector<8x1xf32>
    %14 = arith.divf %12, %13 : vector<8x1xf32>
    %15 = vector.broadcast %7 : vector<8x1xf32> to vector<8x32xf32>
    %16 = arith.subf %1, %15 : vector<8x32xf32>
    %cst_9 = arith.constant 9.99999997E-7 : f32
    %17 = vector.broadcast %cst_9 : f32 to vector<8x1xf32>
    %18 = arith.addf %14, %17 : vector<8x1xf32>
    %19 = math.rsqrt %18 : vector<8x1xf32>
    %20 = vector.broadcast %19 : vector<8x1xf32> to vector<8x32xf32>
    %21 = arith.mulf %16, %20 : vector<8x32xf32>
    %22 = vector.broadcast %2 : vector<1x32xf32> to vector<8x32xf32>
    %23 = arith.mulf %21, %22 : vector<8x32xf32>
    %24 = vector.broadcast %3 : vector<1x32xf32> to vector<8x32xf32>
    %25 = arith.addf %23, %24 : vector<8x32xf32>
    %26 = arith.truncf %25 : vector<8x32xf32> to vector<8x32xbf16>
    %c0_10 = arith.constant 0 : index
    %c0_11 = arith.constant 0 : index
    %27 = vector.load %arg4[%c0_10, %c0_11] : memref<32x96xbf16, #tpu.memory_space<vmem>>, vector<32x96xbf16>
    %cst_12 = arith.constant dense<0.000000e+00> : vector<8x96xf32>
    %28 = tpu.matmul %26, %27, %cst_12 {dimension_numbers = #tpu.dot_dimension_numbers<[1], [0], [0], [1], [0, 0, 1, 1], [], []>} : vector<8x32xbf16>, vector<32x96xbf16>, vector<8x96xf32> -> vector<8x96xf32>
    %c0_13 = arith.constant 0 : index
    %c0_14 = arith.constant 0 : index
    %29 = vector.load %arg5[%c0_13, %c0_14] : memref<1x96xf32, #tpu.memory_space<vmem>>, vector<1x96xf32>
    %30 = vector.broadcast %29 : vector<1x96xf32> to vector<8x96xf32>
    %31 = arith.addf %28, %30 : vector<8x96xf32>
    %cst_15 = arith.constant 0.000000e+00 : f32
    %32 = vector.broadcast %cst_15 : f32 to vector<8x32xf32>
    %33 = vector.extract_strided_slice %31 {offsets = [0, 0], sizes = [8, 8], strides = [1, 1]} : vector<8x96xf32> to vector<8x8xf32>
    %cst_16 = arith.constant 0.353553385 : f32
    %34 = vector.broadcast %cst_16 : f32 to vector<8x8xf32>
    %35 = arith.mulf %33, %34 : vector<8x8xf32>
    %36 = arith.truncf %35 : vector<8x8xf32> to vector<8x8xbf16>
    %37 = vector.extract_strided_slice %31 {offsets = [0, 32], sizes = [8, 8], strides = [1, 1]} : vector<8x96xf32> to vector<8x8xf32>
    %38 = tpu.transpose %37, [1, 0] : vector<8x8xf32> -> vector<8x8xf32>
    %39 = arith.truncf %38 : vector<8x8xf32> to vector<8x8xbf16>
    %40 = vector.extract_strided_slice %31 {offsets = [0, 64], sizes = [8, 8], strides = [1, 1]} : vector<8x96xf32> to vector<8x8xf32>
    %41 = arith.truncf %40 : vector<8x8xf32> to vector<8x8xbf16>
    %cst_17 = arith.constant dense<0.000000e+00> : vector<8x8xf32>
    %42 = tpu.matmul %36, %39, %cst_17 {dimension_numbers = #tpu.dot_dimension_numbers<[1], [0], [0], [1], [0, 0, 1, 1], [], []>} : vector<8x8xbf16>, vector<8x8xbf16>, vector<8x8xf32> -> vector<8x8xf32>
    %cst_18 = arith.constant dense<0xFF800000> : vector<8xf32>
    %43 = vector.multi_reduction <maximumf>, %42, %cst_18 [1] : vector<8x8xf32> to vector<8xf32>
    %44 = vector.shape_cast %43 : vector<8xf32> to vector<8x1xf32>
    %45 = vector.broadcast %44 : vector<8x1xf32> to vector<8x8xf32>
    %46 = arith.subf %42, %45 : vector<8x8xf32>
    %47 = math.exp %46 : vector<8x8xf32>
    %cst_19 = arith.constant dense<0.000000e+00> : vector<8xf32>
    %48 = vector.multi_reduction <add>, %47, %cst_19 [1] : vector<8x8xf32> to vector<8xf32>
    %49 = vector.shape_cast %48 : vector<8xf32> to vector<8x1xf32>
    %50 = tpu.reciprocal %49 {approx = true} : vector<8x1xf32> -> vector<8x1xf32>
    %51 = vector.broadcast %50 : vector<8x1xf32> to vector<8x8xf32>
    %52 = arith.mulf %47, %51 : vector<8x8xf32>
    %53 = arith.truncf %52 : vector<8x8xf32> to vector<8x8xbf16>
    %cst_20 = arith.constant dense<0.000000e+00> : vector<8x8xf32>
    %54 = tpu.matmul %53, %41, %cst_20 {dimension_numbers = #tpu.dot_dimension_numbers<[1], [0], [0], [1], [0, 0, 1, 1], [], []>} : vector<8x8xbf16>, vector<8x8xbf16>, vector<8x8xf32> -> vector<8x8xf32>
    %55 = arith.truncf %54 : vector<8x8xf32> to vector<8x8xbf16>
    %c0_21 = arith.constant 0 : index
    %c0_22 = arith.constant 0 : index
    %56 = vector.load %arg6[%c0_21, %c0_22] : memref<32x32xbf16, #tpu.memory_space<vmem>>, vector<8x32xbf16>
    %cst_23 = arith.constant dense<0.000000e+00> : vector<8x32xf32>
    %57 = tpu.matmul %55, %56, %cst_23 {dimension_numbers = #tpu.dot_dimension_numbers<[1], [0], [0], [1], [0, 0, 1, 1], [], []>} : vector<8x8xbf16>, vector<8x32xbf16>, vector<8x32xf32> -> vector<8x32xf32>
    %58 = arith.addf %32, %57 : vector<8x32xf32>
    %59 = vector.extract_strided_slice %31 {offsets = [0, 8], sizes = [8, 8], strides = [1, 1]} : vector<8x96xf32> to vector<8x8xf32>
    %cst_24 = arith.constant 0.353553385 : f32
    %60 = vector.broadcast %cst_24 : f32 to vector<8x8xf32>
    %61 = arith.mulf %59, %60 : vector<8x8xf32>
    %62 = arith.truncf %61 : vector<8x8xf32> to vector<8x8xbf16>
    %63 = vector.extract_strided_slice %31 {offsets = [0, 40], sizes = [8, 8], strides = [1, 1]} : vector<8x96xf32> to vector<8x8xf32>
    %64 = tpu.transpose %63, [1, 0] : vector<8x8xf32> -> vector<8x8xf32>
    %65 = arith.truncf %64 : vector<8x8xf32> to vector<8x8xbf16>
    %66 = vector.extract_strided_slice %31 {offsets = [0, 72], sizes = [8, 8], strides = [1, 1]} : vector<8x96xf32> to vector<8x8xf32>
    %67 = arith.truncf %66 : vector<8x8xf32> to vector<8x8xbf16>
    %cst_25 = arith.constant dense<0.000000e+00> : vector<8x8xf32>
    %68 = tpu.matmul %62, %65, %cst_25 {dimension_numbers = #tpu.dot_dimension_numbers<[1], [0], [0], [1], [0, 0, 1, 1], [], []>} : vector<8x8xbf16>, vector<8x8xbf16>, vector<8x8xf32> -> vector<8x8xf32>
    %cst_26 = arith.constant dense<0xFF800000> : vector<8xf32>
    %69 = vector.multi_reduction <maximumf>, %68, %cst_26 [1] : vector<8x8xf32> to vector<8xf32>
    %70 = vector.shape_cast %69 : vector<8xf32> to vector<8x1xf32>
    %71 = vector.broadcast %70 : vector<8x1xf32> to vector<8x8xf32>
    %72 = arith.subf %68, %71 : vector<8x8xf32>
    %73 = math.exp %72 : vector<8x8xf32>
    %cst_27 = arith.constant dense<0.000000e+00> : vector<8xf32>
    %74 = vector.multi_reduction <add>, %73, %cst_27 [1] : vector<8x8xf32> to vector<8xf32>
    %75 = vector.shape_cast %74 : vector<8xf32> to vector<8x1xf32>
    %76 = tpu.reciprocal %75 {approx = true} : vector<8x1xf32> -> vector<8x1xf32>
    %77 = vector.broadcast %76 : vector<8x1xf32> to vector<8x8xf32>
    %78 = arith.mulf %73, %77 : vector<8x8xf32>
    %79 = arith.truncf %78 : vector<8x8xf32> to vector<8x8xbf16>
    %cst_28 = arith.constant dense<0.000000e+00> : vector<8x8xf32>
    %80 = tpu.matmul %79, %67, %cst_28 {dimension_numbers = #tpu.dot_dimension_numbers<[1], [0], [0], [1], [0, 0, 1, 1], [], []>} : vector<8x8xbf16>, vector<8x8xbf16>, vector<8x8xf32> -> vector<8x8xf32>
    %81 = arith.truncf %80 : vector<8x8xf32> to vector<8x8xbf16>
    %c8 = arith.constant 8 : index
    %c0_29 = arith.constant 0 : index
    %82 = vector.load %arg6[%c8, %c0_29] : memref<32x32xbf16, #tpu.memory_space<vmem>>, vector<8x32xbf16>
    %cst_30 = arith.constant dense<0.000000e+00> : vector<8x32xf32>
    %83 = tpu.matmul %81, %82, %cst_30 {dimension_numbers = #tpu.dot_dimension_numbers<[1], [0], [0], [1], [0, 0, 1, 1], [], []>} : vector<8x8xbf16>, vector<8x32xbf16>, vector<8x32xf32> -> vector<8x32xf32>
    %84 = arith.addf %58, %83 : vector<8x32xf32>
    %85 = vector.extract_strided_slice %31 {offsets = [0, 16], sizes = [8, 8], strides = [1, 1]} : vector<8x96xf32> to vector<8x8xf32>
    %cst_31 = arith.constant 0.353553385 : f32
    %86 = vector.broadcast %cst_31 : f32 to vector<8x8xf32>
    %87 = arith.mulf %85, %86 : vector<8x8xf32>
    %88 = arith.truncf %87 : vector<8x8xf32> to vector<8x8xbf16>
    %89 = vector.extract_strided_slice %31 {offsets = [0, 48], sizes = [8, 8], strides = [1, 1]} : vector<8x96xf32> to vector<8x8xf32>
    %90 = tpu.transpose %89, [1, 0] : vector<8x8xf32> -> vector<8x8xf32>
    %91 = arith.truncf %90 : vector<8x8xf32> to vector<8x8xbf16>
    %92 = vector.extract_strided_slice %31 {offsets = [0, 80], sizes = [8, 8], strides = [1, 1]} : vector<8x96xf32> to vector<8x8xf32>
    %93 = arith.truncf %92 : vector<8x8xf32> to vector<8x8xbf16>
    %cst_32 = arith.constant dense<0.000000e+00> : vector<8x8xf32>
    %94 = tpu.matmul %88, %91, %cst_32 {dimension_numbers = #tpu.dot_dimension_numbers<[1], [0], [0], [1], [0, 0, 1, 1], [], []>} : vector<8x8xbf16>, vector<8x8xbf16>, vector<8x8xf32> -> vector<8x8xf32>
    %cst_33 = arith.constant dense<0xFF800000> : vector<8xf32>
    %95 = vector.multi_reduction <maximumf>, %94, %cst_33 [1] : vector<8x8xf32> to vector<8xf32>
    %96 = vector.shape_cast %95 : vector<8xf32> to vector<8x1xf32>
    %97 = vector.broadcast %96 : vector<8x1xf32> to vector<8x8xf32>
    %98 = arith.subf %94, %97 : vector<8x8xf32>
    %99 = math.exp %98 : vector<8x8xf32>
    %cst_34 = arith.constant dense<0.000000e+00> : vector<8xf32>
    %100 = vector.multi_reduction <add>, %99, %cst_34 [1] : vector<8x8xf32> to vector<8xf32>
    %101 = vector.shape_cast %100 : vector<8xf32> to vector<8x1xf32>
    %102 = tpu.reciprocal %101 {approx = true} : vector<8x1xf32> -> vector<8x1xf32>
    %103 = vector.broadcast %102 : vector<8x1xf32> to vector<8x8xf32>
    %104 = arith.mulf %99, %103 : vector<8x8xf32>
    %105 = arith.truncf %104 : vector<8x8xf32> to vector<8x8xbf16>
    %cst_35 = arith.constant dense<0.000000e+00> : vector<8x8xf32>
    %106 = tpu.matmul %105, %93, %cst_35 {dimension_numbers = #tpu.dot_dimension_numbers<[1], [0], [0], [1], [0, 0, 1, 1], [], []>} : vector<8x8xbf16>, vector<8x8xbf16>, vector<8x8xf32> -> vector<8x8xf32>
    %107 = arith.truncf %106 : vector<8x8xf32> to vector<8x8xbf16>
    %c16 = arith.constant 16 : index
    %c0_36 = arith.constant 0 : index
    %108 = vector.load %arg6[%c16, %c0_36] : memref<32x32xbf16, #tpu.memory_space<vmem>>, vector<8x32xbf16>
    %cst_37 = arith.constant dense<0.000000e+00> : vector<8x32xf32>
    %109 = tpu.matmul %107, %108, %cst_37 {dimension_numbers = #tpu.dot_dimension_numbers<[1], [0], [0], [1], [0, 0, 1, 1], [], []>} : vector<8x8xbf16>, vector<8x32xbf16>, vector<8x32xf32> -> vector<8x32xf32>
    %110 = arith.addf %84, %109 : vector<8x32xf32>
    %111 = vector.extract_strided_slice %31 {offsets = [0, 24], sizes = [8, 8], strides = [1, 1]} : vector<8x96xf32> to vector<8x8xf32>
    %cst_38 = arith.constant 0.353553385 : f32
    %112 = vector.broadcast %cst_38 : f32 to vector<8x8xf32>
    %113 = arith.mulf %111, %112 : vector<8x8xf32>
    %114 = arith.truncf %113 : vector<8x8xf32> to vector<8x8xbf16>
    %115 = vector.extract_strided_slice %31 {offsets = [0, 56], sizes = [8, 8], strides = [1, 1]} : vector<8x96xf32> to vector<8x8xf32>
    %116 = tpu.transpose %115, [1, 0] : vector<8x8xf32> -> vector<8x8xf32>
    %117 = arith.truncf %116 : vector<8x8xf32> to vector<8x8xbf16>
    %118 = vector.extract_strided_slice %31 {offsets = [0, 88], sizes = [8, 8], strides = [1, 1]} : vector<8x96xf32> to vector<8x8xf32>
    %119 = arith.truncf %118 : vector<8x8xf32> to vector<8x8xbf16>
    %cst_39 = arith.constant dense<0.000000e+00> : vector<8x8xf32>
    %120 = tpu.matmul %114, %117, %cst_39 {dimension_numbers = #tpu.dot_dimension_numbers<[1], [0], [0], [1], [0, 0, 1, 1], [], []>} : vector<8x8xbf16>, vector<8x8xbf16>, vector<8x8xf32> -> vector<8x8xf32>
    %cst_40 = arith.constant dense<0xFF800000> : vector<8xf32>
    %121 = vector.multi_reduction <maximumf>, %120, %cst_40 [1] : vector<8x8xf32> to vector<8xf32>
    %122 = vector.shape_cast %121 : vector<8xf32> to vector<8x1xf32>
    %123 = vector.broadcast %122 : vector<8x1xf32> to vector<8x8xf32>
    %124 = arith.subf %120, %123 : vector<8x8xf32>
    %125 = math.exp %124 : vector<8x8xf32>
    %cst_41 = arith.constant dense<0.000000e+00> : vector<8xf32>
    %126 = vector.multi_reduction <add>, %125, %cst_41 [1] : vector<8x8xf32> to vector<8xf32>
    %127 = vector.shape_cast %126 : vector<8xf32> to vector<8x1xf32>
    %128 = tpu.reciprocal %127 {approx = true} : vector<8x1xf32> -> vector<8x1xf32>
    %129 = vector.broadcast %128 : vector<8x1xf32> to vector<8x8xf32>
    %130 = arith.mulf %125, %129 : vector<8x8xf32>
    %131 = arith.truncf %130 : vector<8x8xf32> to vector<8x8xbf16>
    %cst_42 = arith.constant dense<0.000000e+00> : vector<8x8xf32>
    %132 = tpu.matmul %131, %119, %cst_42 {dimension_numbers = #tpu.dot_dimension_numbers<[1], [0], [0], [1], [0, 0, 1, 1], [], []>} : vector<8x8xbf16>, vector<8x8xbf16>, vector<8x8xf32> -> vector<8x8xf32>
    %133 = arith.truncf %132 : vector<8x8xf32> to vector<8x8xbf16>
    %c24 = arith.constant 24 : index
    %c0_43 = arith.constant 0 : index
    %134 = vector.load %arg6[%c24, %c0_43] : memref<32x32xbf16, #tpu.memory_space<vmem>>, vector<8x32xbf16>
    %cst_44 = arith.constant dense<0.000000e+00> : vector<8x32xf32>
    %135 = tpu.matmul %133, %134, %cst_44 {dimension_numbers = #tpu.dot_dimension_numbers<[1], [0], [0], [1], [0, 0, 1, 1], [], []>} : vector<8x8xbf16>, vector<8x32xbf16>, vector<8x32xf32> -> vector<8x32xf32>
    %136 = arith.addf %110, %135 : vector<8x32xf32>
    %c0_45 = arith.constant 0 : index
    %c0_46 = arith.constant 0 : index
    %137 = vector.load %arg7[%c0_45, %c0_46] : memref<1x32xf32, #tpu.memory_space<vmem>>, vector<1x32xf32>
    %138 = vector.broadcast %137 : vector<1x32xf32> to vector<8x32xf32>
    %139 = arith.addf %136, %138 : vector<8x32xf32>
    %140 = arith.addf %1, %139 : vector<8x32xf32>
    %c0_47 = arith.constant 0 : index
    %c0_48 = arith.constant 0 : index
    %141 = vector.load %arg8[%c0_47, %c0_48] : memref<1x32xf32, #tpu.memory_space<vmem>>, vector<1x32xf32>
    %c0_49 = arith.constant 0 : index
    %c0_50 = arith.constant 0 : index
    %142 = vector.load %arg9[%c0_49, %c0_50] : memref<1x32xf32, #tpu.memory_space<vmem>>, vector<1x32xf32>
    %cst_51 = arith.constant dense<0.000000e+00> : vector<8xf32>
    %143 = vector.multi_reduction <add>, %140, %cst_51 [1] : vector<8x32xf32> to vector<8xf32>
    %144 = vector.shape_cast %143 : vector<8xf32> to vector<8x1xf32>
    %cst_52 = arith.constant 3.200000e+01 : f32
    %145 = vector.broadcast %cst_52 : f32 to vector<8x1xf32>
    %146 = arith.divf %144, %145 : vector<8x1xf32>
    %147 = vector.broadcast %146 : vector<8x1xf32> to vector<8x32xf32>
    %148 = arith.subf %140, %147 : vector<8x32xf32>
    %149 = arith.mulf %148, %148 : vector<8x32xf32>
    %cst_53 = arith.constant dense<0.000000e+00> : vector<8xf32>
    %150 = vector.multi_reduction <add>, %149, %cst_53 [1] : vector<8x32xf32> to vector<8xf32>
    %151 = vector.shape_cast %150 : vector<8xf32> to vector<8x1xf32>
    %cst_54 = arith.constant 3.200000e+01 : f32
    %152 = vector.broadcast %cst_54 : f32 to vector<8x1xf32>
    %153 = arith.divf %151, %152 : vector<8x1xf32>
    %154 = vector.broadcast %146 : vector<8x1xf32> to vector<8x32xf32>
    %155 = arith.subf %140, %154 : vector<8x32xf32>
    %cst_55 = arith.constant 9.99999997E-7 : f32
    %156 = vector.broadcast %cst_55 : f32 to vector<8x1xf32>
    %157 = arith.addf %153, %156 : vector<8x1xf32>
    %158 = math.rsqrt %157 : vector<8x1xf32>
    %159 = vector.broadcast %158 : vector<8x1xf32> to vector<8x32xf32>
    %160 = arith.mulf %155, %159 : vector<8x32xf32>
    %161 = vector.broadcast %141 : vector<1x32xf32> to vector<8x32xf32>
    %162 = arith.mulf %160, %161 : vector<8x32xf32>
    %163 = vector.broadcast %142 : vector<1x32xf32> to vector<8x32xf32>
    %164 = arith.addf %162, %163 : vector<8x32xf32>
    %165 = arith.truncf %164 : vector<8x32xf32> to vector<8x32xbf16>
    %c0_56 = arith.constant 0 : index
    %c0_57 = arith.constant 0 : index
    %166 = vector.load %arg10[%c0_56, %c0_57] : memref<32x64xbf16, #tpu.memory_space<vmem>>, vector<32x64xbf16>
    %cst_58 = arith.constant dense<0.000000e+00> : vector<8x64xf32>
    %167 = tpu.matmul %165, %166, %cst_58 {dimension_numbers = #tpu.dot_dimension_numbers<[1], [0], [0], [1], [0, 0, 1, 1], [], []>} : vector<8x32xbf16>, vector<32x64xbf16>, vector<8x64xf32> -> vector<8x64xf32>
    %c0_59 = arith.constant 0 : index
    %c0_60 = arith.constant 0 : index
    %168 = vector.load %arg11[%c0_59, %c0_60] : memref<1x64xf32, #tpu.memory_space<vmem>>, vector<1x64xf32>
    %169 = vector.broadcast %168 : vector<1x64xf32> to vector<8x64xf32>
    %170 = arith.addf %167, %169 : vector<8x64xf32>
    %cst_61 = arith.constant 5.000000e-01 : f32
    %171 = vector.broadcast %cst_61 : f32 to vector<8x64xf32>
    %172 = arith.mulf %171, %170 : vector<8x64xf32>
    %cst_62 = arith.constant 0.707106769 : f32
    %173 = vector.broadcast %cst_62 : f32 to vector<8x64xf32>
    %174 = arith.mulf %170, %173 : vector<8x64xf32>
    %175 = math.erf %174 : vector<8x64xf32>
    %cst_63 = arith.constant 1.000000e+00 : f32
    %176 = vector.broadcast %cst_63 : f32 to vector<8x64xf32>
    %177 = arith.addf %176, %175 : vector<8x64xf32>
    %178 = arith.mulf %172, %177 : vector<8x64xf32>
    %179 = arith.truncf %178 : vector<8x64xf32> to vector<8x64xbf16>
    %c0_64 = arith.constant 0 : index
    %c0_65 = arith.constant 0 : index
    %180 = vector.load %arg12[%c0_64, %c0_65] : memref<64x32xbf16, #tpu.memory_space<vmem>>, vector<64x32xbf16>
    %cst_66 = arith.constant dense<0.000000e+00> : vector<8x32xf32>
    %181 = tpu.matmul %179, %180, %cst_66 {dimension_numbers = #tpu.dot_dimension_numbers<[1], [0], [0], [1], [0, 0, 1, 1], [], []>} : vector<8x64xbf16>, vector<64x32xbf16>, vector<8x32xf32> -> vector<8x32xf32>
    %c0_67 = arith.constant 0 : index
    %c0_68 = arith.constant 0 : index
    %182 = vector.load %arg13[%c0_67, %c0_68] : memref<1x32xf32, #tpu.memory_space<vmem>>, vector<1x32xf32>
    %183 = vector.broadcast %182 : vector<1x32xf32> to vector<8x32xf32>
    %184 = arith.addf %181, %183 : vector<8x32xf32>
    %185 = arith.addf %140, %184 : vector<8x32xf32>
    %c0_69 = arith.constant 0 : index
    %c0_70 = arith.constant 0 : index
    %c0_71 = arith.constant 0 : index
    %186 = vector.load %arg14[%c0_69, %c0_70, %c0_71] : memref<1x8x32xf32, #tpu.memory_space<vmem>>, vector<1x8x32xf32>
    %187 = vector.shape_cast %186 : vector<1x8x32xf32> to vector<8x32xf32>
    %188 = vector.shape_cast %185 : vector<8x32xf32> to vector<1x8x32xf32>
    tpu.vector_store %arg14[%c0_69, %c0_70, %c0_71], %188 {strides = array<i32>} : memref<1x8x32xf32, #tpu.memory_space<vmem>>, vector<1x8x32xf32>,
    return
  }
  func.func @transform_0(%arg0: i32) -> (i32, i32, i32) {
    %c0_i32 = arith.constant 0 : i32
    %c0_i32_0 = arith.constant 0 : i32
    %c0_i32_1 = arith.constant 0 : i32
    return %arg0, %c0_i32, %c0_i32_0 : i32, i32, i32
  }
  func.func @transform_1(%arg0: i32) -> (i32, i32) {
    %c0_i32 = arith.constant 0 : i32
    %c0_i32_0 = arith.constant 0 : i32
    %c0_i32_1 = arith.constant 0 : i32
    return %c0_i32, %c0_i32_0 : i32, i32
  }
  func.func @transform_2(%arg0: i32) -> (i32, i32) {
    %c0_i32 = arith.constant 0 : i32
    %c0_i32_0 = arith.constant 0 : i32
    %c0_i32_1 = arith.constant 0 : i32
    return %c0_i32, %c0_i32_0 : i32, i32
  }
  func.func @transform_3(%arg0: i32) -> (i32, i32) {
    %c0_i32 = arith.constant 0 : i32
    %c0_i32_0 = arith.constant 0 : i32
    %c0_i32_1 = arith.constant 0 : i32
    return %c0_i32, %c0_i32_0 : i32, i32
  }
  func.func @transform_4(%arg0: i32) -> (i32, i32) {
    %c0_i32 = arith.constant 0 : i32
    %c0_i32_0 = arith.constant 0 : i32
    %c0_i32_1 = arith.constant 0 : i32
    return %c0_i32, %c0_i32_0 : i32, i32
  }
  func.func @transform_5(%arg0: i32) -> (i32, i32) {
    %c0_i32 = arith.constant 0 : i32
    %c0_i32_0 = arith.constant 0 : i32
    %c0_i32_1 = arith.constant 0 : i32
    return %c0_i32, %c0_i32_0 : i32, i32
  }
  func.func @transform_6(%arg0: i32) -> (i32, i32) {
    %c0_i32 = arith.constant 0 : i32
    %c0_i32_0 = arith.constant 0 : i32
    %c0_i32_1 = arith.constant 0 : i32
    return %c0_i32, %c0_i32_0 : i32, i32
  }
  func.func @transform_7(%arg0: i32) -> (i32, i32) {
    %c0_i32 = arith.constant 0 : i32
    %c0_i32_0 = arith.constant 0 : i32
    %c0_i32_1 = arith.constant 0 : i32
    return %c0_i32, %c0_i32_0 : i32, i32
  }
  func.func @transform_8(%arg0: i32) -> (i32, i32) {
    %c0_i32 = arith.constant 0 : i32
    %c0_i32_0 = arith.constant 0 : i32
    %c0_i32_1 = arith.constant 0 : i32
    return %c0_i32, %c0_i32_0 : i32, i32
  }
  func.func @transform_9(%arg0: i32) -> (i32, i32) {
    %c0_i32 = arith.constant 0 : i32
    %c0_i32_0 = arith.constant 0 : i32
    %c0_i32_1 = arith.constant 0 : i32
    return %c0_i32, %c0_i32_0 : i32, i32
  }
  func.func @transform_10(%arg0: i32) -> (i32, i32) {
    %c0_i32 = arith.constant 0 : i32
    %c0_i32_0 = arith.constant 0 : i32
    %c0_i32_1 = arith.constant 0 : i32
    return %c0_i32, %c0_i32_0 : i32, i32
  }
  func.func @transform_11(%arg0: i32) -> (i32, i32) {
    %c0_i32 = arith.constant 0 : i32
    %c0_i32_0 = arith.constant 0 : i32
    %c0_i32_1 = arith.constant 0 : i32
    return %c0_i32, %c0_i32_0 : i32, i32
  }
  func.func @transform_12(%arg0: i32) -> (i32, i32) {
    %c0_i32 = arith.constant 0 : i32
    %c0_i32_0 = arith.constant 0 : i32
    %c0_i32_1 = arith.constant 0 : i32
    return %c0_i32, %c0_i32_0 : i32, i32
  }
  func.func @transform_13(%arg0: i32) -> (i32, i32, i32) {
    %c0_i32 = arith.constant 0 : i32
    %c0_i32_0 = arith.constant 0 : i32
    %c0_i32_1 = arith.constant 0 : i32
    return %arg0, %c0_i32, %c0_i32_0 : i32, i32, i32
  }
}

</mosaic_0001>

<bundles_post_ra>
// kernel: tpu_custom_call.1
= control target key start
LH: loop header
LB: loop body
LE: loop exit
PB: predicated region body
PF: predicated region fallthrough
CT: control target
= control target key end

     0   :  { %s2643_s0 = inlined_call_operand.vmem [shape: f32[2,8,32], index: 0, kind: input, shape index: {}]   ;;  %s2644_s1 = inlined_call_operand.vmem [shape: f32[1,32], index: 1, kind: input, shape index: {}]   ;;  %s2645_s2 = inlined_call_operand.vmem [shape: f32[1,32], index: 2, kind: input, shape index: {}]   ;;  %s2646_s3 = inlined_call_operand.vmem [shape: bf16[32,96], index: 3, kind: input, shape index: {}]   ;;  %s2647_s4 = inlined_call_operand.hbm [shape: f32[1,96], index: 4, kind: input, shape index: {}]   ;;  %s2648_s5 = inlined_call_operand.vmem [shape: bf16[32,32], index: 5, kind: input, shape index: {}]   ;;  %s2649_s6 = inlined_call_operand.hbm [shape: f32[1,32], index: 6, kind: input, shape index: {}]   ;;  %s2650_s7 = inlined_call_operand.hbm [shape: f32[1,32], index: 7, kind: input, shape index: {}]   ;;  %s2651_s8 = inlined_call_operand.hbm [shape: f32[1,32], index: 8, kind: input, shape index: {}]   ;;  %s2652_s9 = inlined_call_operand.vmem [shape: bf16[32,64], index: 9, kind: input, shape index: {}]   ;;  %s2653_s10 = inlined_call_operand.vmem [shape: f32[1,64], index: 10, kind: input, shape index: {}]   ;;  %s2654_s11 = inlined_call_operand.vmem [shape: bf16[64,32], index: 11, kind: input, shape index: {}]   ;;  %s2655_s12 = inlined_call_operand.vmem [shape: f32[1,32], index: 12, kind: input, shape index: {}]   ;;  %s2656_s13 = inlined_call_operand.hbm [shape: f32[2,8,32], index: 13, kind: output, shape index: {}]  }
   0x1   :  { %2667 = sst [smem:[#allocation21_spill]] %s2656_s13 }
   0x2   :  { %18 = vsyncpa [#allocation3], 0 }
   0x3   :  { %19 = vsyncpa [#allocation6], 0 }
   0x4   :  { %20 = vsyncpa [#allocation9], 0 }
   0x5   :  { %21 = vsyncpa [#allocation4], 0 }
   0x6   :  { %23 = vsyncpa [#allocation4 + $0x1], 0  ;;  %s2256_s25 = smov 0   ;;  %s2258_s26 = smov 0  }
   0x7   :  { %s2260_s27 = smov 0   ;;  %s2262_s28 = smov 0  }
   0x8 LB: > { %2668 = sst [smem:[#allocation15_spill]] %s2154_s25  ;;  %s2277_s29 = sadd.s32 4294967295, %s2166_s28   ;;  %s2166_s28 = sphi %s2262_s28, %s2692_s28   ;;  %s2162_s27 = sphi %s2260_s27, %s2694_s27   ;;  %s2158_s26 = sphi %s2258_s26, %s2696_s26   ;;  %s2154_s25 = sphi %s2256_s25, %s2695_s25  }
   0x9   : > { %2669 = sst [smem:[#allocation16_spill]] %s2162_s27  ;;  %s1673_s30 = sadd.s32 4294967294, %s2166_s28  }
   0xa   : > { %2670 = sst [smem:[#allocation17_spill]] %s2166_s28  ;;  %s2281_s14 = sadd.s32 1, %s2166_s28  }
   0xb   : > { %2671 = sst [smem:[#allocation18_spill]] %s2281_s14  ;;  %s314_s15 = sadd.s32 1, %s2162_s27 }
   0xc   : > { %s311_s16 = ssub.s32 %s2166_s28, %s2281_s14  ;;  %p324_p0 = scmp.ne.s32.totalorder %s2162_s27, %s2158_s26 }
   0xd   : > { %p312_p1 = scmp.eq.s32.totalorder %s311_s16, 0  ;;  %p325_p2 = scmp.eq.s32.totalorder %s2277_s29, 1 }
   0xe   : > { %p330_p3 = scmp.ne.s32.totalorder %s2158_s26, %s2154_s25  ;;  %p331_p4 = scmp.eq.s32.totalorder %s1673_s30, 1 }
   0xf   : > { %s2292_s17 = scalar_select %p312_p1, %s2162_s27, %s314_s15  }
  0x10   : > { %p2294_p5 = por %p325_p2, %p324_p0  ;;  %p2298_p6 = por %p331_p4, %p330_p3 }
  0x11   : > { %2672 = sst [smem:[#allocation19_spill]] %s2292_s17  ;;  %p1674_p7 = scmp.ge.s32.totalorder %s2166_s28, 1 }
  0x12   : > { %s2673_s18 = scalar_select %p2294_p5, 1, 0 }
  0x13   : > { %s2674_s19 = scalar_select %p2298_p6, 1, 0 }
  0x14   : > { %p338_p8 = scmp.lt.s32.totalorder %s2166_s28, 3  ;;  %p2662_p9 = scmp.eq.s32.totalorder %s2277_s29, 0 }
  0x15   : > { %2675 = sst [smem:[#allocation20_spill]] %s2674_s19  ;;  %s2168_s21 = smov [#allocation5]  }
  0x16   : > { %p2305_p10 = pnand %p1674_p7, %p338_p8  ;;  %s374_s22 = sshll.u32 %s2168_s21, 4  ;;  %s375_s22 = int_to_ptr.vmem [resolvable:$true] %s374_s22 }
  0x17   : > { %s2169_s23 = smov [#allocation2]   ;;  %s2170_s15 = smov [#allocation7]  }
  0x18   : > { %s2676_s20 = scalar_select %p2305_p10, 1, 0 }
  0x19   : > { %p1875_p11 = pneg %p2305_p10  ;;  %s360_s24 = sshll.u32 %s2169_s23, 4  ;;  %s2317_s24 = int_to_ptr.vmem [resolvable:$true] %s360_s24 }
  0x1a   : > { %s385_s16 = sshll.u32 %s2170_s15, 4  ;;  %s1980_s21 = scalar_lea.hbm %s2649_s6, 16  ;;  %s2319_s16 = int_to_ptr.vmem [resolvable:$true] %s385_s16 }
  0x1b   : > { %p2313_p12 = pnand %p2662_p9, %p1875_p11  ;;  %p1981_p13 = scmp.ne.s32.totalorder %s2649_s6, %s1980_s21 }
  0x1c   : > { %p1987_p3 = scmp.lt.u32.totalorder %s1980_s21, %s2649_s6 }
  0x1d   : > { %p2329_p0 = pneg %p2313_p12 }
  0x1f   : > { %p1983_p1 = pnand %p2329_p0, %p1981_p13 }
  0x21   : > { %p1984_p2 = pneg %p1983_p1 }
  0x23   : > { %p1989_p4 = pnand %p1987_p3, %p1984_p2 }
  0x25   : > { %1992 = shalt.err (!%p1989_p4)
}
  0x26   : > { %s1993_s27 = scalar_lea.vmem %s375_s22, 16  ;;  %s2000_s14 = scalar_lea.vmem %s375_s22, 32 }
  0x27   : > { %p1994_p7 = scmp.ne.s32.totalorder %s375_s22, %s1993_s27  ;;  %p2001_p9 = scmp.lt.s32.totalorder %s375_s22, %s375_s22 }
  0x28   : > { %p2002_p6 = scmp.lt.s32.totalorder %s2000_s14, %s1993_s27 }
  0x29   : > { %p1996_p8 = pnand %p1994_p7, %p2329_p0 }
  0x2a   : > { %p2003_p5 = por %p2002_p6, %p2001_p9 }
  0x2b   : > { %p1997_p11 = pneg %p1996_p8 }
  0x2d   : > { %p2004_p10 = pnand %p2003_p5, %p1997_p11 }
  0x2f   : > { %2007 = shalt.err (!%p2004_p10)
}
  0x30   : > { %1881 = dma.hbm_to_vmem [thread:$0]  (!%p2313_p12), %s2649_s6, 16, %s375_s22, [#allocation6]  }
  0x31   : > { %s2008_s15 = scalar_lea.hbm %s2647_s4, 16 }
  0x32   : > { %p2009_p13 = scmp.ne.s32.totalorder %s2647_s4, %s2008_s15  ;;  %p2015_p5 = scmp.lt.u32.totalorder %s2008_s15, %s2647_s4 }
  0x34   : > { %p2011_p1 = pnand %p2009_p13, %p2329_p0 }
  0x36   : > { %p2012_p6 = pneg %p2011_p1 }
  0x38   : > { %p2017_p9 = pnand %p2015_p5, %p2012_p6 }
  0x3a   : > { %2020 = shalt.err (!%p2017_p9)
}
  0x3b   : > { %s2021_s22 = scalar_lea.vmem %s2317_s24, 16  ;;  %s2028_s13 = scalar_lea.vmem %s2317_s24, 32 }
  0x3c   : > { %p2022_p10 = scmp.ne.s32.totalorder %s2317_s24, %s2021_s22  ;;  %p2029_p4 = scmp.lt.s32.totalorder %s2317_s24, %s2317_s24 }
  0x3d   : > { %p2030_p7 = scmp.lt.s32.totalorder %s2028_s13, %s2021_s22 }
  0x3e   : > { %p2024_p2 = pnand %p2022_p10, %p2329_p0 }
  0x3f   : > { %p2031_p8 = por %p2030_p7, %p2029_p4 }
  0x40   : > { %p2025_p3 = pneg %p2024_p2 }
  0x42   : > { %p2032_p11 = pnand %p2031_p8, %p2025_p3 }
  0x44   : > { %2035 = shalt.err (!%p2032_p11)
}
  0x45   : > { %1878 = dma.hbm_to_vmem [thread:$0]  (!%p2313_p12), %s2647_s4, 16, %s2317_s24, [#allocation3]  }
  0x46   : > { %s2036_s21 = scalar_lea.hbm %s2650_s7, 16 }
  0x47   : > { %p2037_p13 = scmp.ne.s32.totalorder %s2650_s7, %s2036_s21  ;;  %p2043_p5 = scmp.lt.u32.totalorder %s2036_s21, %s2650_s7 }
  0x49   : > { %p2039_p1 = pnand %p2037_p13, %p2329_p0 }
  0x4b   : > { %p2040_p6 = pneg %p2039_p1 }
  0x4d   : > { %p2045_p9 = pnand %p2043_p5, %p2040_p6 }
  0x4f   : > { %2048 = shalt.err (!%p2045_p9)
}
  0x50   : > { %s2049_s24 = scalar_lea.vmem %s2319_s16, 16  ;;  %s2056_s13 = scalar_lea.vmem %s2319_s16, 32 }
  0x51   : > { %p2050_p10 = scmp.ne.s32.totalorder %s2319_s16, %s2049_s24  ;;  %p2057_p4 = scmp.lt.s32.totalorder %s2319_s16, %s2319_s16 }
  0x52   : > { %p2058_p7 = scmp.lt.s32.totalorder %s2056_s13, %s2049_s24 }
  0x53   : > { %p2052_p2 = pnand %p2050_p10, %p2329_p0 }
  0x54   : > { %p2059_p8 = por %p2058_p7, %p2057_p4 }
  0x55   : > { %p2053_p3 = pneg %p2052_p2 }
  0x57   : > { %p2060_p11 = pnand %p2059_p8, %p2053_p3 }
  0x59   : > { %2063 = shalt.err (!%p2060_p11)
}
  0x5a   : > { %1884 = dma.hbm_to_vmem [thread:$0]  (!%p2313_p12), %s2650_s7, 16, %s2319_s16, [#allocation6]  }
  0x5b   : > { %s2171_s19 = smov [#allocation8]   ;;  %s2064_s27 = scalar_lea.hbm %s2651_s8, 16 }
  0x5c   : > { %s396_s25 = sshll.u32 %s2171_s19, 4  ;;  %p2065_p13 = scmp.ne.s32.totalorder %s2651_s8, %s2064_s27  ;;  %s397_s25 = int_to_ptr.vmem [resolvable:$true] %s396_s25 }
  0x5d   : > { %p2071_p5 = scmp.lt.u32.totalorder %s2064_s27, %s2651_s8 }
  0x5e   : > { %p2067_p1 = pnand %p2065_p13, %p2329_p0 }
  0x60   : > { %p2068_p6 = pneg %p2067_p1 }
  0x62   : > { %p2073_p9 = pnand %p2071_p5, %p2068_p6 }
  0x64   : > { %2076 = shalt.err (!%p2073_p9)
}
  0x65   : > { %s2077_s16 = scalar_lea.vmem %s397_s25, 16  ;;  %s2084_s28 = scalar_lea.vmem %s397_s25, 32 }
  0x66   : > { %p2078_p10 = scmp.ne.s32.totalorder %s397_s25, %s2077_s16  ;;  %p2085_p4 = scmp.lt.s32.totalorder %s397_s25, %s397_s25 }
  0x67   : > { %p2086_p7 = scmp.lt.s32.totalorder %s2084_s28, %s2077_s16 }
  0x68   : > { %p2080_p2 = pnand %p2078_p10, %p2329_p0 }
  0x69   : > { %p2087_p8 = por %p2086_p7, %p2085_p4 }
  0x6a   : > { %p2081_p3 = pneg %p2080_p2 }
  0x6c   : > { %p2088_p11 = pnand %p2087_p8, %p2081_p3 }
  0x6e   : > { %2091 = shalt.err (!%p2088_p11)
}
  0x6f   : > { %1887 = dma.hbm_to_vmem [thread:$0]  (!%p2313_p12), %s2651_s8, 16, %s397_s25, [#allocation9]  }
  0x70   : > { %p2679_p13 = scmp.ne.s32.totalorder %s2676_s20, 0 }
  0x71   : > { %p2680_p1 = scmp.eq.s32.totalorder (!%p2679_p13), %s2277_s29, 0 }
  0x72   : > { %428 = sbr.rel (%p2679_p13) target bundleno = 3948 (0xf6c), region = 72 }
  0x79   : > { %2137 = dma.done.wait (%p2680_p1), [#allocation3], 16   ;;  %p2681_p0 = pmov %p2680_p1 }
  0x7b   : > { %2139 = vsyncadd (%p2681_p0), [#allocation3], 4294967280  ;;  %p2682_p6 = pmov %p2681_p0 }
  0x7c   : > { %p2683_p5 = pmov %p2681_p0 }
  0x7d   : > { %2141 = dma.done.wait (%p2682_p6), [#allocation6], 32  }
  0x7e   : > { %2143 = vsyncadd (%p2683_p5), [#allocation6], 4294967264  ;;  %p2684_p9 = pmov %p2681_p0 }
  0x7f   : > { %p2685_p12 = pmov %p2681_p0 }
  0x80   : > { %2145 = dma.done.wait (%p2684_p9), [#allocation9], 16  }
  0x81   : > { %2147 = vsyncadd (%p2685_p12), [#allocation9], 4294967280  ;;  %p483_p10 = scmp.lt.s32.totalorder %s2277_s29, 1  ;;  %vm491_vm0 = vcmask 261120   ;;  %v1950_v7 = vld [vmem:[%s2646_s3] sm:$0xff]   ;;  %v2172_v8 = vmov 0.0  }
  0x82   : > { %1757 = vmatprep.subr.bf16.mxu0 %v2172_v8  ;;  %vm2173_vm1 = vmmov 0   ;;  %v1951_v9 = vld [vmem:[%s2646_s3 + $0x8] sm:$0xff]   ;;  %1771 = vmatprep.subr.bf16.mxu1 %v2172_v8  ;;  %v1687_v14 = vld [vmem:[%s2644_s1] ss:$0 sm:$0xff]  ;;  %s2174_s17 = smov 96   ;;  %s2175_s19 = smov 88  }
  0x83   : > { %s484_s20 = scalar_select %p483_p10, %s2277_s29, 1  ;;  %1761 = vmatprep.mubr.msk.bf16.mxu0 %vm2173_vm1, %v2172_v8  ;;  %1758 = vmatpush3.bf16.msra.mxu0 %v1950_v7  ;;  %v1688_v16 = vld [vmem:[%s2645_s2] ss:$0 sm:$0xff]  ;;  %vm631_vm2 = vcmask 1043456   ;;  %vm627_vm3 = vcmask 64512   ;;  %vm1513_vm4 = vcmask 523264  }
  0x84   : > { %1759 = vmatprep.subr.bf16.mxu0 %v2172_v8  ;;  %1773 = vmatprep.mubr.msk.bf16.mxu1 %vm2173_vm1, %v2172_v8  ;;  %v1689_v20 = vld [vmem:[#allocation2] ss:$0 sm:$0xff]  ;;  %s2178_s23 = smov 64   ;;  %s2179_s25 = smov 80  }
  0x85   : > { %s1686_s30 = sshll.u32 %s484_s20, 3  ;;  %s2176_s20 = smov 120  }
  0x86   : > { %s486_s21 = scalar_lea.vmem %s2643_s0, %s1686_s30  ;;  %s2177_s30 = smov 56  }
  0x87   : > { %v2430_v0 = vld [vmem:[%s486_s21] sm:$0xff]  ;;  %1760 = vmatpush3.bf16.msra.mxu0 %v1951_v9  ;;  %s2180_s21 = smov 112   ;;  %s2181_s24 = smov 72  }
  0x88   : > { %v492_v1 = vsel %vm491_vm0, %v2430_v0, 0.0  ;;  %1765 = vmatprep.subr.bf16.mxu0 %v2172_v8  ;;  %v737_v9 = vld [vmem:[%s2648_s5] sm:$0xf]  ;;  %s2182_s13 = smov 48   ;;  %s2183_s16 = smov 104  }
  0x89   : > { %493 = vadd.xlane.f32.xlu0 %v492_v1  ;;  %s1719_s15 = sshll.u32 %s2277_s29, 7  ;;  %p2687_p3 = scmp.ne.s32.totalorder %s2673_s18, 0 }
 0x116   : > { %v494_v2 = vpop.xlane.xlu0 %493 }
 0x117   : > { %v496_v3 = vmul.f32 0.03125, %v494_v2 }
 0x119   : > { %v497_v4 = vsub.f32 %v2430_v0, %v496_v3 }
 0x11b   : > { %v498_v5 = vmul.f32 %v497_v4, %v497_v4 }
 0x11d   : > { %v499_v6 = vsel %vm491_vm0, %v498_v5, 0.0 }
 0x11e   : > { %500 = vadd.xlane.f32.xlu0 %v499_v6 }
 0x1ab   : > { %v501_v10 = vpop.xlane.xlu0 %500 }
 0x1ac   : > { %v502_v11 = vmul.f32 0.03125, %v501_v10  ;;  %v935_v10 = vsel %vm631_vm2, %v737_v9, 0 }
 0x1ae   : > { %v503_v12 = vadd.f32 1e-06, %v502_v11  ;;  %v884_v11 = vld [vmem:[%s2648_s5 + $0x4] sm:$0xf] }
 0x1b0   : > { %1958 = vrsqrt.f32 %v503_v12  ;;  %v889_v12 = vsel %vm631_vm2, %v884_v11, 0 }
 0x1ba   : > { %v1959_v13 = vpop.eup %1958 }
 0x1bb   : > { %v505_v15 = vmul.f32 %v1959_v13, %v497_v4 }
 0x1bd   : > { %v512_v17 = vmul.f32 %v1687_v14, %v505_v15 }
 0x1bf   : > { %v519_v18 = vadd.f32 %v1688_v16, %v512_v17 }
 0x1c1   : > { %v520_v19 = vpack.c.bf16 %v519_v18, %v519_v18 }
 0x1c3   : > { %1762 = vmatmul.mubr.msk.bf16.vlgmr.msra.gmra.mrb[0].mxu0 %vm491_vm0, %v520_v19 }
 0x1c4   : > { %1767 = vmatprep.mubr.msk.bf16.mxu0 %vm2173_vm1, %v2172_v8 }
 0x296   : > { %v581_v21 = vpop.f32.mrb[0].mxu0 }
 0x297   : > { %v2459_v22 = vadd.f32 %v1689_v20, %v581_v21  ;;  %v1763_v23 = vpop.f32.mrb[1].mxu0 }
 0x298   : > { %v584_v24 = vpop.f32.mrb[2].mxu0 }
 0x299   : > { %590 = vrot.lane.b32.xlu1 %v2459_v22, %s2174_s17  ;;  %v1764_v25 = vpop.f32.mrb[3].mxu0  ;;  %v587_v26 = vmul.f32 0.35355338, %v2459_v22  ;;  %v2482_v47 = vpack.c.bf16 %v2459_v22, %v2459_v22  ;;  %s2185_s17 = smov [#allocation10]  }
 0x29b   : > { %v2463_v27 = vpack.c.bf16 %v587_v26, %v587_v26 }
 0x29d   : > { %738 = vrot.lane.b32.xlu1 %v2459_v22, %s2175_s19  ;;  %775 = vrot.lane.b32.xlu0 %v2463_v27, %s2176_s20  ;;  %s2184_s19 = smov 40  }
 0x30b   : > { %v591_v28 = vpop.permute.xlu1 %590 }
 0x30c   : > { %593 = vxpose.xlu1.b32.start.end [1/1] (short) (narrow) %v591_v28, 8 }
 0x30f   : > { %v739_v29 = vpop.permute.xlu1 %738  ;;  %v776_v30 = vpop.permute.xlu0 %775 }
 0x310   : > { %741 = vxpose.xlu0.b32.start.end [1/1] (short) (narrow) %v739_v29, 8 }
 0x38c   : > { %v609_v31 = vpop.trf.xlu1 }
 0x38d   : > { %v625_v32 = vpack.c.bf16 %v609_v31, %v609_v31 }
 0x38f   : > { %v633_v33 = vsel %vm631_vm2, %v625_v32, 0 }
 0x390   : > { %1766 = vmatpush3.bf16.msra.mxu0 %v633_v33  ;;  %v757_v34 = vpop.trf.xlu0 }
 0x391   : > { %v773_v35 = vpack.c.bf16 %v757_v34, %v757_v34  ;;  %1777 = vmatprep.subr.bf16.mxu0 %v2172_v8 }
 0x393   : > { %1768 = vmatmul.mubr.msk.bf16.vlgmr.msra.gmra.mrb[4].mxu0 %vm627_vm3, %v2463_v27  ;;  %v781_v36 = vsel %vm631_vm2, %v773_v35, 0 }
 0x394   : > { %1778 = vmatpush3.bf16.msra.mxu0 %v781_v36  ;;  %1779 = vmatprep.mubr.msk.bf16.mxu0 %vm2173_vm1, %v2172_v8 }
 0x395   : > { %1789 = vmatprep.subr.bf16.mxu0 %v2172_v8 }
 0x39b   : > { %1780 = vmatmul.mubr.msk.bf16.vlgmr.msra.gmra.mrb[8].mxu0 %vm627_vm3, %v776_v30 }
 0x39c   : > { %1791 = vmatprep.mubr.msk.bf16.mxu0 %vm2173_vm1, %v2172_v8  ;;  %1790 = vmatpush3.bf16.msra.mxu0 %v889_v12 }
 0x39d   : > { %1801 = vmatprep.subr.bf16.mxu0 %v2172_v8 }
 0x466   : > { %v669_v37 = vpop.f32.mrb[4].mxu0 }
 0x467   : > { %v1769_v38 = vpop.f32.mrb[5].mxu0  ;;  %v675_v39 = vsel %vm627_vm3, %v669_v37, -inf }
 0x468   : > { %676 = vmax.xlane.f32.xlu1 %v675_v39  ;;  %v672_v40 = vpop.f32.mrb[6].mxu0 }
 0x469   : > { %v1770_v41 = vpop.f32.mrb[7].mxu0 }
 0x46e   : > { %v817_v42 = vpop.f32.mrb[8].mxu0 }
 0x46f   : > { %v1781_v43 = vpop.f32.mrb[9].mxu0  ;;  %v823_v44 = vsel %vm627_vm3, %v817_v42, -inf }
 0x470   : > { %824 = vmax.xlane.f32.xlu0 %v823_v44  ;;  %v820_v45 = vpop.f32.mrb[10].mxu0 }
 0x471   : > { %v1782_v46 = vpop.f32.mrb[11].mxu0 }
 0x486   : > { %835 = vrot.lane.b32.xlu0 %v2482_v47, %s2177_s30  ;;  %s480_s30 = sand.u32 1, %s2158_s26  }
 0x487   : > { %s1560_s29 = scalar_lea.sflag [#allocation4], %s480_s30 }
 0x4f5   : > { %v677_v48 = vpop.xlane.xlu1 %676 }
 0x4f6   : > { %v678_v49 = vsub.f32 %v669_v37, %v677_v48 }
 0x4f8   : > { %v679_v50 = vmul.f32 1.442695, %v678_v49 }
 0x4fa   : > { %1960 = vpow2.f32 %v679_v50 }
 0x4fd   : > { %v825_v51 = vpop.xlane.xlu0 %824 }
 0x4fe   : > { %v826_v52 = vsub.f32 %v817_v42, %v825_v51 }
 0x500   : > { %v827_v53 = vmul.f32 1.442695, %v826_v52 }
 0x501   : > { %v836_v1 = vpop.permute.xlu0 %835 }
 0x502   : > { %1962 = vpow2.f32 %v827_v53  ;;  %v841_v4 = vsel %vm631_vm2, %v836_v1, 0 }
 0x504   : > { %v1961_v54 = vpop.eup %1960 }
 0x505   : > { %v681_v55 = vsel %vm627_vm3, %v1961_v54, 0.0 }
 0x506   : > { %682 = vadd.xlane.f32.xlu1 %v681_v55 }
 0x50c   : > { %v1963_v56 = vpop.eup %1962 }
 0x50d   : > { %v829_v57 = vsel %vm627_vm3, %v1963_v56, 0.0 }
 0x50e   : > { %830 = vadd.xlane.f32.xlu1 %v829_v57 }
 0x51f   : > { %688 = vrot.lane.b32.xlu1 %v2482_v47, %s2178_s23  ;;  %s1685_s23 = sshll.u32 %s480_s30, 3 }
 0x520   : > { %s482_s27 = scalar_lea.vmem [#allocation10], %s1685_s23 }
 0x521   : > { %s1573_s14 = sshll.u32 %s482_s27, 4  ;;  %s2602_s14 = int_to_ptr.vmem [resolvable:$true] %s1573_s14 }
 0x522   : > { %s2092_s28 = scalar_lea.vmem %s2602_s14, 128 }
 0x523   : > { %977 = vrot.lane.b32.xlu1 %v2459_v22, %s2179_s25  ;;  %p2093_p2 = scmp.ne.s32.totalorder %s2602_s14, %s2092_s28 }
 0x525   : > { %p2094_p4 = pnand %p2093_p2, %p2687_p3 }
 0x527   : > { %1013 = vrot.lane.b32.xlu1 %v2463_v27, %s2180_s21  ;;  %p2095_p7 = pneg %p2094_p4 }
 0x593   : > { %v683_v58 = vpop.xlane.xlu1 %682 }
 0x594   : > { %1964 = vrcp.f32 %v683_v58  ;;  %v1122_v58 = vld [vmem:[%s2648_s5 + $0x8] sm:$0xf] }
 0x59b   : > { %v831_v59 = vpop.xlane.xlu1 %830 }
 0x59c   : > { %1966 = vrcp.f32 %v831_v59  ;;  %v1127_v59 = vsel %vm631_vm2, %v1122_v58, 0  ;;  %v1956_v58 = vld [vmem:[%s2654_s11 + $0x10] sm:$0xff]  }
 0x59e   : > { %v1965_v60 = vpop.eup %1964 }
 0x59f   : > { %v689_v61 = vpop.permute.xlu1 %688  ;;  %v685_v62 = vmul.f32 %v1965_v60, %v1961_v54 }
 0x5a0   : > { %v694_v63 = vsel %vm631_vm2, %v689_v61, 0 }
 0x5a1   : > { %1772 = vmatpush3.bf16.msra.mxu1 %v694_v63  ;;  %v686_v2 = vpack.c.bf16 %v685_v62, %v685_v62 }
 0x5a2   : > { %1783 = vmatprep.subr.bf16.mxu1 %v2172_v8 }
 0x5a3   : > { %v978_v3 = vpop.permute.xlu1 %977 }
 0x5a4   : > { %1774 = vmatmul.mubr.msk.bf16.vlgmr.msra.gmra.mrb[0].mxu1 %vm627_vm3, %v686_v2  ;;  %980 = vxpose.xlu1.b32.start.end [1/1] (short) (narrow) %v978_v3, 8 }
 0x5a5   : > { %1784 = vmatpush3.bf16.msra.mxu1 %v841_v4  ;;  %1785 = vmatprep.mubr.msk.bf16.mxu1 %vm2173_vm1, %v2172_v8 }
 0x5a6   : > { %v1967_v5 = vpop.eup %1966  ;;  %1795 = vmatprep.subr.bf16.mxu1 %v2172_v8 }
 0x5a7   : > { %v833_v6 = vmul.f32 %v1967_v5, %v1963_v56  ;;  %v1014_v13 = vpop.permute.xlu1 %1013 }
 0x5a9   : > { %v834_v7 = vpack.c.bf16 %v833_v6, %v833_v6 }
 0x5ac   : > { %1786 = vmatmul.mubr.msk.bf16.vlgmr.msra.gmra.mrb[4].mxu1 %vm627_vm3, %v834_v7 }
 0x5ad   : > { %1797 = vmatprep.mubr.msk.bf16.mxu1 %vm2173_vm1, %v2172_v8  ;;  %1796 = vmatpush3.bf16.msra.mxu1 %v935_v10 }
 0x5ae   : > { %1807 = vmatprep.subr.bf16.mxu1 %v2172_v8 }
 0x624   : > { %v996_v18 = vpop.trf.xlu1 }
 0x625   : > { %v1012_v20 = vpack.c.bf16 %v996_v18, %v996_v18 }
 0x627   : > { %v1019_v25 = vsel %vm631_vm2, %v1012_v20, 0 }
 0x677   : > { %v730_v14 = vpop.f32.mrb[0].mxu1 }
 0x678   : > { %v736_v15 = vpack.c.bf16 %v730_v14, %v730_v14  ;;  %v1775_v16 = vpop.f32.mrb[1].mxu1 }
 0x679   : > { %v733_v17 = vpop.f32.mrb[2].mxu1 }
 0x67a   : > { %v1776_v19 = vpop.f32.mrb[3].mxu1  ;;  %1798 = vmatmul.mubr.msk.bf16.vlgmr.msra.gmra.mrb[8].mxu1 %vm627_vm3, %v736_v15 }
 0x67b   : > { %1809 = vmatprep.mubr.msk.bf16.mxu1 %vm2173_vm1, %v2172_v8 }
 0x67f   : > { %v877_v21 = vpop.f32.mrb[4].mxu1 }
 0x680   : > { %v883_v23 = vpack.c.bf16 %v877_v21, %v877_v21  ;;  %v1787_v24 = vpop.f32.mrb[5].mxu1 }
 0x681   : > { %v880_v26 = vpop.f32.mrb[6].mxu1 }
 0x682   : > { %v1788_v28 = vpop.f32.mrb[7].mxu1  ;;  %1792 = vmatmul.mubr.msk.bf16.vlgmr.msra.gmra.mrb[12].mxu0 %vm627_vm3, %v883_v23 }
 0x683   : > { %1802 = vmatpush3.bf16.msra.mxu0 %v1019_v25  ;;  %1803 = vmatprep.mubr.msk.bf16.mxu0 %vm2173_vm1, %v2172_v8 }
 0x684   : > { %1813 = vmatprep.subr.bf16.mxu0 %v2172_v8 }
 0x68a   : > { %1804 = vmatmul.mubr.msk.bf16.vlgmr.msra.gmra.mrb[16].mxu0 %vm627_vm3, %v1014_v13 }
 0x68b   : > { %1815 = vmatprep.mubr.msk.bf16.mxu0 %vm2173_vm1, %v2172_v8  ;;  %1814 = vmatpush3.bf16.msra.mxu0 %v1127_v59  ;;  %v1957_v59 = vld [vmem:[%s2654_s11 + $0x18] sm:$0xff]  }
 0x68c   : > { %1825 = vmatprep.subr.bf16.mxu0 %v2172_v8 }
 0x74d   : > { %v971_v29 = vpop.f32.mrb[8].mxu1 }
 0x74e   : > { %v1799_v30 = vpop.f32.mrb[9].mxu1 }
 0x74f   : > { %v974_v31 = vpop.f32.mrb[10].mxu1 }
 0x750   : > { %v1800_v32 = vpop.f32.mrb[11].mxu1 }
 0x755   : > { %v925_v33 = vpop.f32.mrb[12].mxu0 }
 0x756   : > { %v2521_v34 = vadd.f32 %v971_v29, %v925_v33  ;;  %v1793_v35 = vpop.f32.mrb[13].mxu0  ;;  %v1705_v33 = vld [vmem:[#allocation5] ss:$0 sm:$0xff] }
 0x757   : > { %v928_v36 = vpop.f32.mrb[14].mxu0 }
 0x758   : > { %v1794_v37 = vpop.f32.mrb[15].mxu0 }
 0x75d   : > { %v1055_v38 = vpop.f32.mrb[16].mxu0 }
 0x75e   : > { %v1805_v39 = vpop.f32.mrb[17].mxu0  ;;  %v1061_v40 = vsel %vm627_vm3, %v1055_v38, -inf }
 0x75f   : > { %1062 = vmax.xlane.f32.xlu0 %v1061_v40  ;;  %v1058_v41 = vpop.f32.mrb[18].mxu0 }
 0x760   : > { %v1806_v42 = vpop.f32.mrb[19].mxu0 }
 0x775   : > { %1170 = vrot.lane.b32.xlu0 %v2459_v22, %s2181_s24 }
 0x779   : > { %1073 = vrot.lane.b32.xlu0 %v2482_v47, %s2182_s13  ;;  %s2686_s13 = sld [smem:[#allocation21_spill]] }
 0x77d   : > { %1206 = vrot.lane.b32.xlu0 %v2463_v27, %s2183_s16 }
 0x77f   : > { %s2600_s16 = scalar_lea.hbm %s2686_s13, %s1719_s15 }
 0x7ec   : > { %v1063_v43 = vpop.xlane.xlu0 %1062 }
 0x7ed   : > { %v1064_v44 = vsub.f32 %v1055_v38, %v1063_v43 }
 0x7ef   : > { %v1065_v45 = vmul.f32 1.442695, %v1064_v44 }
 0x7f0   : > { %v1171_v46 = vpop.permute.xlu0 %1170 }
 0x7f1   : > { %1968 = vpow2.f32 %v1065_v45  ;;  %1173 = vxpose.xlu0.b32.start.end [1/1] (short) (narrow) %v1171_v46, 8  ;;  %v1952_v46 = vld [vmem:[%s2652_s9] sm:$0xff]  }
 0x7f4   : > { %v1074_v48 = vpop.permute.xlu0 %1073 }
 0x7f5   : > { %v1079_v49 = vsel %vm631_vm2, %v1074_v48, 0 }
 0x7f6   : > { %1808 = vmatpush3.bf16.msra.mxu1 %v1079_v49 }
 0x7f7   : > { %1819 = vmatprep.subr.bf16.mxu1 %v2172_v8 }
 0x7f8   : > { %v1207_v52 = vpop.permute.xlu0 %1206 }
 0x7fb   : > { %v1969_v50 = vpop.eup %1968 }
 0x7fc   : > { %v1067_v22 = vsel %vm627_vm3, %v1969_v50, 0.0 }
 0x7fd   : > { %1068 = vadd.xlane.f32.xlu1 %v1067_v22 }
 0x871   : > { %v1189_v27 = vpop.trf.xlu0 }
 0x872   : > { %v1205_v53 = vpack.c.bf16 %v1189_v27, %v1189_v27  ;;  %v1707_v27 = vld [vmem:[#allocation8] ss:$0 sm:$0xff] }
 0x874   : > { %v1212_v57 = vsel %vm631_vm2, %v1205_v53, 0 }
 0x88a   : > { %v1069_v51 = vpop.xlane.xlu1 %1068 }
 0x88b   : > { %1970 = vrcp.f32 %v1069_v51  ;;  %v1706_v51 = vld [vmem:[#allocation7] ss:$0 sm:$0xff] }
 0x895   : > { %v1971_v54 = vpop.eup %1970 }
 0x896   : > { %v1071_v55 = vmul.f32 %v1971_v54, %v1969_v50 }
 0x898   : > { %v1072_v56 = vpack.c.bf16 %v1071_v55, %v1071_v55 }
 0x89a   : > { %1810 = vmatmul.mubr.msk.bf16.vlgmr.msra.gmra.mrb[12].mxu1 %vm627_vm3, %v1072_v56  ;;  %v1954_v56 = vld [vmem:[%s2654_s11] sm:$0xff]  }
 0x89b   : > { %1820 = vmatpush3.bf16.msra.mxu1 %v1212_v57  ;;  %1821 = vmatprep.mubr.msk.bf16.mxu1 %vm2173_vm1, %v2172_v8  ;;  %v1955_v57 = vld [vmem:[%s2654_s11 + $0x8] sm:$0xff]  }
 0x89c   : > { %1831 = vmatprep.subr.bf16.mxu1 %v2172_v8 }
 0x8a2   : > { %1822 = vmatmul.mubr.msk.bf16.vlgmr.msra.gmra.mrb[16].mxu1 %vm627_vm3, %v1207_v52 }
 0x8a3   : > { %1833 = vmatprep.mubr.msk.bf16.mxu1 %vm2173_vm1, %v2172_v8 }
 0x96d   : > { %v1115_v60 = vpop.f32.mrb[12].mxu1 }
 0x96e   : > { %v1121_v61 = vpack.c.bf16 %v1115_v60, %v1115_v60  ;;  %v1811_v62 = vpop.f32.mrb[13].mxu1  ;;  %v1708_v60 = vld [vmem:[%s2653_s10] ss:$0 sm:$0xff] }
 0x96f   : > { %v1118_v63 = vpop.f32.mrb[14].mxu1 }
 0x970   : > { %v1812_v1 = vpop.f32.mrb[15].mxu1  ;;  %1816 = vmatmul.mubr.msk.bf16.vlgmr.msra.gmra.mrb[20].mxu0 %vm627_vm3, %v1121_v61 }
 0x971   : > { %1827 = vmatprep.mubr.msk.bf16.mxu0 %vm2173_vm1, %v2172_v8 }
 0x975   : > { %v1248_v2 = vpop.f32.mrb[16].mxu1 }
 0x976   : > { %v1823_v3 = vpop.f32.mrb[17].mxu1  ;;  %v1254_v4 = vsel %vm627_vm3, %v1248_v2, -inf }
 0x977   : > { %1255 = vmax.xlane.f32.xlu1 %v1254_v4  ;;  %v1251_v5 = vpop.f32.mrb[18].mxu1 }
 0x978   : > { %v1824_v6 = vpop.f32.mrb[19].mxu1 }
 0xa04   : > { %v1256_v7 = vpop.xlane.xlu1 %1255 }
 0xa05   : > { %v1257_v9 = vsub.f32 %v1248_v2, %v1256_v7 }
 0xa07   : > { %v1258_v10 = vmul.f32 1.442695, %v1257_v9  ;;  %v1712_v9 = vld [vmem:[%s2655_s12] ss:$0 sm:$0xff] }
 0xa09   : > { %1972 = vpow2.f32 %v1258_v10 }
 0xa13   : > { %v1973_v11 = vpop.eup %1972 }
 0xa14   : > { %v1260_v12 = vsel %vm627_vm3, %v1973_v11, 0.0 }
 0xa15   : > { %1261 = vadd.xlane.f32.xlu1 %v1260_v12 }
 0xa26   : > { %1266 = vrot.lane.b32.xlu1 %v2482_v47, %s2184_s19  ;;  %v1315_v47 = vld [vmem:[%s2648_s5 + $0xc] sm:$0xf]  ;;  %s2096_s19 = sshll.u32 %s2185_s17, 4  ;;  %s2097_s19 = int_to_ptr.vmem [resolvable:$false] %s2096_s19 }
 0xa27   : > { %v1320_v25 = vsel %vm631_vm2, %v1315_v47, 0  ;;  %s2098_s20 = scalar_lea.vmem %s2097_s19, 256  ;;  %p2099_p8 = scmp.lt.s32.totalorder %s2602_s14, %s2097_s19 }
 0xa28   : > { %1832 = vmatpush3.bf16.msra.mxu1 %v1320_v25  ;;  %p2100_p11 = scmp.lt.s32.totalorder %s2098_s20, %s2092_s28 }
 0xa29   : > { %1845 = vmatprep.subr.bf16.mxu1 %v2172_v8 }
 0xa2a   : > { %p2101_p13 = por %p2100_p11, %p2099_p8 }
 0xa2c   : > { %p2102_p1 = pnand %p2101_p13, %p2095_p7 }
 0xa43   : > { %v1163_v13 = vpop.f32.mrb[20].mxu0 }
 0xa44   : > { %v1169_v14 = vadd.f32 %v1163_v13, %v2521_v34  ;;  %v1817_v15 = vpop.f32.mrb[21].mxu0 }
 0xa45   : > { %v1166_v16 = vpop.f32.mrb[22].mxu0 }
 0xa46   : > { %v1818_v17 = vpop.f32.mrb[23].mxu0 }
 0xaa2   : > { %v1262_v18 = vpop.xlane.xlu1 %1261 }
 0xaa3   : > { %1974 = vrcp.f32 %v1262_v18 }
 0xaa6   : > { %v1267_v19 = vpop.permute.xlu1 %1266 }
 0xaa7   : > { %v1272_v20 = vsel %vm631_vm2, %v1267_v19, 0 }
 0xaa8   : > { %1826 = vmatpush3.bf16.msra.mxu0 %v1272_v20 }
 0xaa9   : > { %1837 = vmatprep.subr.bf16.mxu0 %v2172_v8 }
 0xaad   : > { %v1975_v21 = vpop.eup %1974 }
 0xaae   : > { %v1264_v23 = vmul.f32 %v1975_v21, %v1973_v11 }
 0xab0   : > { %v1265_v24 = vpack.c.bf16 %v1264_v23, %v1264_v23 }
 0xab2   : > { %1828 = vmatmul.mubr.msk.bf16.vlgmr.msra.gmra.mrb[24].mxu0 %vm627_vm3, %v1265_v24 }
 0xab3   : > { %1841 = vmatprep.mubr.msk.bf16.mxu0 %vm2173_vm1, %v2172_v8  ;;  %1838 = vmatpush3.bf16.msra.mxu0 %v1952_v46 }
 0xab4   : > { %1839 = vmatprep.subr.bf16.mxu0 %v2172_v8 }
 0xb85   : > { %v1308_v26 = vpop.f32.mrb[24].mxu0 }
 0xb86   : > { %v1314_v28 = vpack.c.bf16 %v1308_v26, %v1308_v26  ;;  %v1829_v29 = vpop.f32.mrb[25].mxu0 }
 0xb87   : > { %v1311_v30 = vpop.f32.mrb[26].mxu0 }
 0xb88   : > { %v1830_v31 = vpop.f32.mrb[27].mxu0  ;;  %1834 = vmatmul.mubr.msk.bf16.vlgmr.msra.gmra.mrb[20].mxu1 %vm627_vm3, %v1314_v28 }
 0xb89   : > { %1853 = vmatprep.mubr.msk.bf16.mxu1 %vm2173_vm1, %v2172_v8  ;;  %1846 = vmatpush3.bf16.msra.mxu1 %v1954_v56 }
 0xb8a   : > { %1847 = vmatprep.subr.bf16.mxu1 %v2172_v8 }
 0xb8d   : > { %1848 = vmatpush3.bf16.msra.mxu1 %v1955_v57 }
 0xb8e   : > { %1849 = vmatprep.subr.bf16.mxu1 %v2172_v8 }
 0xb91   : > { %1850 = vmatpush3.bf16.msra.mxu1 %v1956_v58 }
 0xb92   : > { %1851 = vmatprep.subr.bf16.mxu1 %v2172_v8 }
 0xb95   : > { %1852 = vmatpush3.bf16.msra.mxu1 %v1957_v59 }
 0xc5b   : > { %v1356_v32 = vpop.f32.mrb[20].mxu1 }
 0xc5c   : > { %v1362_v34 = vadd.f32 %v1356_v32, %v1169_v14  ;;  %v1835_v35 = vpop.f32.mrb[21].mxu1 }
 0xc5d   : > { %v1359_v36 = vpop.f32.mrb[22].mxu1 }
 0xc5e   : > { %v1370_v37 = vadd.f32 %v1705_v33, %v1362_v34  ;;  %v1836_v38 = vpop.f32.mrb[23].mxu1 }
 0xc60   : > { %v1371_v39 = vadd.f32 %v1370_v37, %v2430_v0  ;;  %v1953_v0 = vld [vmem:[%s2652_s9 + $0x8] sm:$0xff]  }
 0xc61   : > { %1840 = vmatpush3.bf16.msra.mxu0 %v1953_v0 }
 0xc62   : > { %v1374_v40 = vsel %vm491_vm0, %v1371_v39, 0.0 }
 0xc63   : > { %1375 = vadd.xlane.f32.xlu0 %v1374_v40 }
 0xcf0   : > { %v1376_v41 = vpop.xlane.xlu0 %1375 }
 0xcf1   : > { %v1377_v42 = vmul.f32 0.03125, %v1376_v41 }
 0xcf3   : > { %v1378_v43 = vsub.f32 %v1371_v39, %v1377_v42 }
 0xcf5   : > { %v1379_v44 = vmul.f32 %v1378_v43, %v1378_v43 }
 0xcf7   : > { %v1380_v45 = vsel %vm491_vm0, %v1379_v44, 0.0 }
 0xcf8   : > { %1381 = vadd.xlane.f32.xlu1 %v1380_v45 }
 0xd85   : > { %v1382_v48 = vpop.xlane.xlu1 %1381 }
 0xd86   : > { %v1383_v49 = vmul.f32 0.03125, %v1382_v48 }
 0xd88   : > { %v1384_v50 = vadd.f32 1e-06, %v1383_v49 }
 0xd8a   : > { %1976 = vrsqrt.f32 %v1384_v50 }
 0xd94   : > { %v1977_v22 = vpop.eup %1976 }
 0xd95   : > { %v1386_v52 = vmul.f32 %v1977_v22, %v1378_v43 }
 0xd97   : > { %v1393_v53 = vmul.f32 %v1706_v51, %v1386_v52 }
 0xd99   : > { %v1400_v54 = vadd.f32 %v1707_v27, %v1393_v53 }
 0xd9b   : > { %v1401_v55 = vpack.c.bf16 %v1400_v54, %v1400_v54 }
 0xd9d   : > { %1842 = vmatmul.mubr.msk.bf16.vlgmr.msra.gmra.mrb[28].mxu0 %vm491_vm0, %v1401_v55 }
 0xe70   : > { %v1462_v61 = vpop.f32.mrb[28].mxu0 }
 0xe71   : > { %v1463_v62 = vadd.f32 %v1708_v60, %v1462_v61  ;;  %v1843_v63 = vpop.f32.mrb[29].mxu0 }
 0xe72   : > { %v1465_v1 = vpop.f32.mrb[30].mxu0 }
 0xe73   : > { %v1469_v2 = vmul.f32 0.70710677, %v1463_v62  ;;  %v1844_v3 = vpop.f32.mrb[31].mxu0  ;;  %v1468_v8 = vmul.f32 0.5, %v1463_v62 }
 0xe75   : > { %1978 = verf.f32 %v1469_v2 }
 0xe7f   : > { %v1979_v4 = vpop.eup %1978 }
 0xe80   : > { %v1471_v5 = vadd.f32 1.0, %v1979_v4 }
 0xe82   : > { %v1472_v6 = vmul.f32 %v1471_v5, %v1468_v8 }
 0xe84   : > { %v1473_v7 = vpack.c.bf16 %v1472_v6, %v1472_v6 }
 0xe86   : > { %1854 = vmatmul.mubr.msk.bf16.vlgmr.msra.gmra.mrb[24].mxu1 %vm1513_vm4, %v1473_v7 }
 0xf59   : > { %v1551_v10 = vpop.f32.mrb[24].mxu1 }
 0xf5a   : > { %v1552_v11 = vadd.f32 %v1712_v9, %v1551_v10  ;;  %v1855_v12 = vpop.f32.mrb[25].mxu1 }
 0xf5b   : > { %v1554_v13 = vpop.f32.mrb[26].mxu1 }
 0xf5c   : > { %v1557_v14 = vadd.f32 %v1552_v11, %v1371_v39  ;;  %v1856_v15 = vpop.f32.mrb[27].mxu1 }
 0xf5e   : > { %1558 = vst.msk [vmem:[%s482_s27] sm:$0xff] %vm491_vm0, %v1557_v14 }
 0xf5f   : > { %2105 = shalt.err (!%p2102_p1)
}
 0xf60   : > { %s2106_s30 = scalar_lea.hbm %s2600_s16, 128  ;;  %s2110_s21 = scalar_lea.hbm %s2686_s13, 256 }
 0xf61   : > { %p2107_p0 = scmp.ne.s32.totalorder %s2600_s16, %s2106_s30  ;;  %p2111_p9 = scmp.lt.u32.totalorder %s2600_s16, %s2686_s13 }
 0xf62   : > { %p2112_p12 = scmp.lt.u32.totalorder %s2110_s21, %s2106_s30  ;;  %p2114_p2 = scmp.lt.u32.totalorder %s2106_s30, %s2600_s16 }
 0xf63   : > { %p2108_p6 = pnand %p2107_p0, %p2687_p3 }
 0xf64   : > { %p2113_p10 = por %p2112_p12, %p2111_p9 }
 0xf65   : > { %p2109_p5 = pneg %p2108_p6 }
 0xf66   : > { %p2115_p4 = por %p2114_p2, %p2113_p10 }
 0xf68   : > { %p2116_p7 = pnand %p2115_p4, %p2109_p5 }
 0xf6a   : > { %2119 = shalt.err (!%p2116_p7)
}
 0xf6b   : > { %1873 = dma.vmem_to_hbm [thread:$0]  (%p2687_p3), %s2602_s14, 128, %s2600_s16, %s1560_s29  }
 0xf6c PF: > { %s2688_s22 = sld [smem:[#allocation17_spill]]  ;;  %s2689_s24 = sld [smem:[#allocation15_spill]] }
 0xf6d   : > { %s2690_s28 = sld [smem:[#allocation20_spill]] }
 0xf72   : > { %p1900_p8 = scmp.ge.s32.totalorder %s2688_s22, 2  ;;  %s1585_s17 = sand.u32 1, %s2689_s24  }
 0xf73   : > { %p2691_p11 = scmp.ne.s32.totalorder %s2690_s28, 0  ;;  %s1586_s19 = scalar_lea.sflag [#allocation4], %s1585_s17 }
 0xf75   : > { %p1889_p13 = pnand %p1900_p8, %p2691_p11 }
 0xf77   : > { %2149 = dma.done.wait (!%p1889_p13), %s1586_s19, 128  }
 0xf78   : > { %2151 = vsyncadd (!%p1889_p13), %s1586_s19, 4294967168  ;;  %s2692_s28 = sld [smem:[#allocation18_spill]]  ;;  %s2693_s20 = sld [smem:[#allocation16_spill]] }
 0xf79   : > { %s2694_s27 = sld [smem:[#allocation19_spill]]  ;;  %s2695_s25 = smov %s2158_s26 }
 0xf7e   : > { %p26_p1 = scmp.ge.s32.totalorder %s2692_s28, 4   ;;  %s2696_s26 = smov %s2693_s20 }
 0xf80   :  { %28 = sbr.rel (!%p26_p1) target bundleno = 8 (0x8), region = 124 }
 0xf87   :  { %1591 = vsyncpa [#allocation3], 1 }
 0xf88   :  { %1593 = vsyncpa [#allocation3 + $0x1], 1 }
 0xf89   :  { %1594 = vsyncpa [#allocation6], 1 }
 0xf8a   :  { %1595 = vsyncpa [#allocation9], 1 }
 0xf8b   :  { %1596 = vsyncpa [#allocation4], 1 }
 0xf8c   :  { %1598 = vsyncpa [#allocation4 + $0x1], 1 }

</bundles_post_ra>
